<compile_context>
chip_gen: v7x
topology: tpu7x:2x2x1
jax: 0.10.0
libtpu: 0.0.40
codegen_flags: <defaults>
</compile_context>

<pallas_src>
import jax
import jax.numpy as jnp
from jax.experimental import pallas as pl
from jax.experimental.pallas import tpu as pltpu

EPS = 1e-12
LANES = 128
SUBLANES = 8


def _l2_rowwise_kernel(x_ref, o_ref):
    """Per-row L2 normalize; block is (tile_m, D) with D = full feature extent."""
    x = x_ref[...]
    xf = x.astype(jnp.float32)
    ss = jnp.sum(xf * xf, axis=-1, keepdims=True)              # (tile_m, 1)
    inv = jax.lax.rsqrt(jnp.maximum(ss, EPS * EPS))             # == 1 / max(||x||, eps)
    if o_ref.dtype == jnp.dtype(jnp.bfloat16):
        o_ref[...] = x * inv.astype(x.dtype)                    # bf16 VALU scale on v6e/v7x
    else:
        o_ref[...] = (xf * inv).astype(o_ref.dtype)


def _l2_packed_kernel(seg_ref, x_ref, o_ref):
    """Lane-dense path: block is (tile_r, 128) with 128//D samples packed per row.

    seg_ref is a (128, 128) block-diagonal 0/1 matrix; (x*x) @ seg gives every lane the
    sum of squares of its own sample (segmented reduce + broadcast in one MXU op).
    """
    xf = x_ref[...].astype(jnp.float32)
    ss = jnp.dot(xf * xf, seg_ref[...],
                 preferred_element_type=jnp.float32,
                 precision=jax.lax.Precision.HIGHEST)           # keep f32 accuracy on MXU
    inv = jax.lax.rsqrt(jnp.maximum(ss, EPS * EPS))
    o_ref[...] = (xf * inv).astype(o_ref.dtype)


def _choose_tile_rows(n_rows, n_cols, itemsize, target_bytes=2 << 20, cap=1024):
    """Largest multiple-of-8 divisor of n_rows giving ~target_bytes per block (<= cap rows)."""
    if n_rows <= SUBLANES:
        return n_rows
    tile = max(1, target_bytes // max(1, n_cols * itemsize))
    tile = min(tile, cap, n_rows)
    tile = (tile // SUBLANES) * SUBLANES
    if tile < SUBLANES:
        return n_rows
    while tile > SUBLANES and n_rows % tile != 0:
        tile -= SUBLANES
    if n_rows % tile != 0:
        return n_rows
    return tile


def _compiler_params(block_bytes):
    # in + out, double-buffered, plus headroom; stay well under v7x's 64 MiB physical VMEM
    # while overriding v5e's small 16 MiB scoped default when larger tiles are picked.
    limit = int(min(48 << 20, max(16 << 20, 6 * block_bytes)))
    return pltpu.CompilerParams(
        dimension_semantics=("parallel",),
        vmem_limit_bytes=limit,
    )


def simclr_normalize(x, *, tile_m=None):
    """L2-normalize each row of (N, D): F.normalize(x, p=2, dim=1, eps=1e-12)."""
    N, D = x.shape
    itemsize = jnp.dtype(x.dtype).itemsize

    # Lane-dense fast path for small feature dims: pack 128//D samples per 128-lane row.
    if tile_m is None and D < LANES and LANES % D == 0 and N % (LANES // D) == 0:
        group = LANES // D
        rows = N // group
        xp = x.reshape(rows, LANES)
        # Block-diagonal segment matrix: seg[i, j] = 1 iff lanes i and j belong to the same sample.
        lane_seg = jnp.arange(LANES) // D
        seg = (lane_seg[:, None] == lane_seg[None, :]).astype(jnp.float32)

        tile_r = _choose_tile_rows(rows, LANES, itemsize)
        grid = (rows // tile_r,)
        out = pl.pallas_call(
            _l2_packed_kernel,
            out_shape=jax.ShapeDtypeStruct((rows, LANES), x.dtype),
            grid_spec=pltpu.PrefetchScalarGridSpec(
                num_scalar_prefetch=0,
                grid=grid,
                in_specs=[
                    pl.BlockSpec((LANES, LANES), lambda i: (0, 0)),    # seg stays resident
                    pl.BlockSpec((tile_r, LANES), lambda i: (i, 0)),
                ],
                out_specs=pl.BlockSpec((tile_r, LANES), lambda i: (i, 0)),
            ),
            compiler_params=_compiler_params(tile_r * LANES * itemsize),
        )(seg, xp)
        return out.reshape(N, D)

    # General row-wise path (full feature extent as the last block dim).
    if tile_m is None:
        tile_m = _choose_tile_rows(N, D, itemsize)
    if N % tile_m != 0:
        raise ValueError("tile_m must divide N")
    if tile_m != N and tile_m % SUBLANES != 0:
        raise ValueError("tile_m must be a multiple of 8 (or equal to N)")

    grid = (N // tile_m,)
    return pl.pallas_call(
        _l2_rowwise_kernel,
        out_shape=jax.ShapeDtypeStruct((N, D), x.dtype),
        grid_spec=pltpu.PrefetchScalarGridSpec(
            num_scalar_prefetch=0,
            grid=grid,
            in_specs=[pl.BlockSpec((tile_m, D), lambda i: (i, 0))],
            out_specs=pl.BlockSpec((tile_m, D), lambda i: (i, 0)),
        ),
        compiler_params=_compiler_params(tile_m * D * itemsize),
    )(x)


if __name__ == "__main__":
    def ref_normalize(x):
        norm = jnp.sqrt(jnp.sum(x.astype(jnp.float32) ** 2, axis=1, keepdims=True))
        return (x.astype(jnp.float32) / jnp.maximum(norm, EPS)).astype(x.dtype)

    # SimCLR projection-head style embeddings: batch=8, hidden=32 (lane-dense packed path).
    x_small = jax.random.normal(jax.random.PRNGKey(0), (8, 32), dtype=jnp.float32)
    out_small = jax.block_until_ready(simclr_normalize(x_small))
    assert out_small.shape == x_small.shape and out_small.dtype == x_small.dtype
    assert jnp.max(jnp.abs(out_small - ref_normalize(x_small))) < 1e-5

    # Larger feature dim exercising the tiled, multi-step-grid row-wise path.
    x_big = jax.random.normal(jax.random.PRNGKey(1), (64, 256), dtype=jnp.float32)
    out_big = jax.block_until_ready(simclr_normalize(x_big, tile_m=16))
    assert jnp.max(jnp.abs(out_big - ref_normalize(x_big))) < 1e-5

    print("KERNEL_OK")
</pallas_src>

<mosaic_0001>
module attributes {stable_mosaic.version = 11 : i64} {
  func.func @_l2_packed_kernel(%arg0: i32, %arg1: memref<128x128xf32, #tpu.memory_space<vmem>>, %arg2: memref<2x128xf32, #tpu.memory_space<vmem>>, %arg3: memref<2x128xf32, #tpu.memory_space<vmem>>) attributes {dimension_semantics = [#tpu.dimension_semantics<parallel>], iteration_bounds = array<i64: 1>, scalar_prefetch = 0 : i64, scratch_operands = 0 : i64, tpu.core_type = #tpu.core_type<tc>, window_params = [{pipeline_mode = #tpu.pipeline_mode<synchronous>, transform_indices = @transform_0, window_bounds = array<i64: 128, 128>}, {transform_indices = @transform_1, window_bounds = array<i64: 2, 128>}, {transform_indices = @transform_2, window_bounds = array<i64: 2, 128>}]} {
    %c0 = arith.constant 0 : index
    %c0_0 = arith.constant 0 : index
    %0 = vector.load %arg2[%c0, %c0_0] : memref<2x128xf32, #tpu.memory_space<vmem>>, vector<2x128xf32>
    %1 = arith.mulf %0, %0 : vector<2x128xf32>
    %c0_1 = arith.constant 0 : index
    %c0_2 = arith.constant 0 : index
    %2 = vector.load %arg1[%c0_1, %c0_2] : memref<128x128xf32, #tpu.memory_space<vmem>>, vector<128x128xf32>
    %cst = arith.constant dense<0.000000e+00> : vector<2x128xf32>
    %3 = tpu.matmul %1, %2, %cst {dimension_numbers = #tpu.dot_dimension_numbers<[1], [0], [0], [1], [0, 0, 1, 1], [], []>, precision = #tpu.contract_precision<fp32>} : vector<2x128xf32>, vector<128x128xf32>, vector<2x128xf32> -> vector<2x128xf32>
    %cst_3 = arith.constant 1.000000e-24 : f32
    %4 = vector.broadcast %cst_3 : f32 to vector<2x128xf32>
    %5 = arith.maximumf %3, %4 : vector<2x128xf32>
    %6 = math.rsqrt %5 : vector<2x128xf32>
    %7 = arith.mulf %0, %6 : vector<2x128xf32>
    %c0_4 = arith.constant 0 : index
    %c0_5 = arith.constant 0 : index
    %8 = vector.load %arg3[%c0_4, %c0_5] : memref<2x128xf32, #tpu.memory_space<vmem>>, vector<2x128xf32>
    tpu.vector_store %arg3[%c0_4, %c0_5], %7 {strides = array<i32>} : memref<2x128xf32, #tpu.memory_space<vmem>>, vector<2x128xf32>,
    return
  }
  func.func @transform_0(%arg0: i32) -> (i32, i32) {
    %c0_i32 = arith.constant 0 : i32
    %c0_i32_0 = arith.constant 0 : i32
    %c0_i32_1 = arith.constant 0 : i32
    return %c0_i32, %c0_i32_0 : i32, i32
  }
  func.func @transform_1(%arg0: i32) -> (i32, i32) {
    %c0_i32 = arith.constant 0 : i32
    %c0_i32_0 = arith.constant 0 : i32
    return %arg0, %c0_i32 : i32, i32
  }
  func.func @transform_2(%arg0: i32) -> (i32, i32) {
    %c0_i32 = arith.constant 0 : i32
    %c0_i32_0 = arith.constant 0 : i32
    return %arg0, %c0_i32 : i32, i32
  }
}

</mosaic_0001>

<bundles_post_ra>
// kernel: tpu_custom_call.1
= control target key start
LH: loop header
LB: loop body
LE: loop exit
PB: predicated region body
PF: predicated region fallthrough
CT: control target
= control target key end

     0   :  { %7 = vsyncpa [#allocation3], 0  ;;  %s1527_s0 = inlined_call_operand.hbm [shape: f32[128,128], index: 0, kind: input, shape index: {}]   ;;  %s1528_s1 = inlined_call_operand.vmem [shape: f32[2,128], index: 1, kind: input, shape index: {}]   ;;  %s1529_s2 = inlined_call_operand.hbm [shape: f32[2,128], index: 2, kind: output, shape index: {}]  }
   0x1   :  { %8 = vsyncpa [#allocation4], 0  ;;  %s1226_s9 = smov [#allocation2]   ;;  %s1178_s13 = scalar_lea.hbm %s1527_s0, 2048 }
   0x2   :  { %s14_s10 = sshll.u32 %s1226_s9, 4  ;;  %p1179_p0 = scmp.ne.s32.totalorder %s1527_s0, %s1178_s13  ;;  %s15_s10 = int_to_ptr.vmem [resolvable:$true] %s14_s10 }
   0x3   :  { %p1182_p1 = scmp.lt.u32.totalorder %s1178_s13, %s1527_s0 }
   0x5   :  { %p1184_p2 = pnand %p1182_p1, %p1179_p0 }
   0x7   :  { %1187 = shalt.err (!%p1184_p2)
}
   0x8   :  { %s1188_s18 = scalar_lea.vmem %s15_s10, 2048  ;;  %p1193_p4 = scmp.lt.s32.totalorder %s15_s10, %s15_s10 }
   0x9   :  { %p1189_p3 = scmp.ne.s32.totalorder %s15_s10, %s1188_s18  ;;  %p1194_p5 = scmp.lt.s32.totalorder %s1188_s18, %s1188_s18 }
   0xb   :  { %p1195_p6 = por %p1194_p5, %p1193_p4 }
   0xd   :  { %p1196_p7 = pnand %p1195_p6, %p1189_p3 }
   0xf   :  { %1199 = shalt.err (!%p1196_p7)
}
  0x10   :  { %s1227_s19 = smov 128   ;;  %s1228_s20 = smov 8  }
  0x11   :  { %20 = dma.hbm_to_vmem [thread:$0]  %s1527_s0, 2048, %s15_s10, [#allocation3], %s1227_s19, %s1227_s19, %s1228_s20  }
  0x12   :  { %1222 = dma.done.wait [#allocation3], 2048  }
  0x13   :  { %1223 = vsyncadd [#allocation3], 4294965248  ;;  %v1229_v0 = vmov 0.0|0.0   ;;  %vm1230_vm0 = vmmov 0   ;;  %v1231_v1 = vmov 0.0   ;;  %v28_v2 = vld [vmem:[#allocation2] sm:$0xff] }
  0x14   :  { %1016 = vmatprep.subr.bf16.mxu1 %v1229_v0  ;;  %1088 = vmatprep.subr.bf16.mxu0 %v1229_v0  ;;  %v29_v3 = vld [vmem:[#allocation2 + $0x8] sm:$0xff]  ;;  %v30_v4 = vld [vmem:[#allocation2 + $0x10] sm:$0xff]  ;;  %v45_v5 = vand.u32 4294901760, %v28_v2  ;;  %v31_v7 = vld [vmem:[#allocation2 + $0x18] sm:$0xff] }
  0x15   :  { %838 = vmatprep.mubr.msk.f32.mxu1 %vm1230_vm0, %v1231_v1  ;;  %943 = vmatprep.mubr.msk.f32.mxu0 %vm1230_vm0, %v1231_v1  ;;  %v48_v6 = vand.u32 4294901760, %v29_v3  ;;  %v51_v8 = vand.u32 4294901760, %v30_v4  ;;  %v54_v9 = vand.u32 4294901760, %v31_v7  ;;  %v32_v10 = vld [vmem:[#allocation2 + $0x20] sm:$0xff]  ;;  %v33_v11 = vld [vmem:[#allocation2 + $0x28] sm:$0xff]  ;;  %v34_v16 = vld [vmem:[#allocation2 + $0x30] sm:$0xff] }
  0x16   :  { %v57_v14 = vand.u32 4294901760, %v32_v10  ;;  %v60_v15 = vand.u32 4294901760, %v33_v11  ;;  %v35_v17 = vld [vmem:[#allocation2 + $0x38] sm:$0xff]  ;;  %v63_v19 = vand.u32 4294901760, %v34_v16  ;;  %v1281_v21 = vld [vmem:[%s1528_s1] sm:$0x3]  ;;  %v1303_v30 = vsub.f32 %v28_v2, %v45_v5 }
  0x17   :  { %v1266_v12 = vpack.c.bf16 %v48_v6, %v45_v5  ;;  %v1270_v13 = vpack.c.bf16 %v54_v9, %v51_v8  ;;  %v66_v20 = vand.u32 4294901760, %v35_v17  ;;  %v1285_v22 = vld [vmem:[#allocation2 + $0x40] sm:$0xff]  ;;  %v1287_v23 = vld [vmem:[#allocation2 + $0x48] sm:$0xff]  ;;  %v27_v24 = vmul.f32 %v1281_v21, %v1281_v21  ;;  %v1299_v28 = vld [vmem:[#allocation2 + $0x50] sm:$0xff]  ;;  %s1232_s1 = smov [#allocation5]  }
  0x18   :  { %v1276_v18 = vpack.c.bf16 %v60_v15, %v57_v14  ;;  %v69_v26 = vand.u32 4294901760, %v1285_v22  ;;  %v72_v27 = vand.u32 4294901760, %v1287_v23  ;;  %v1301_v29 = vld [vmem:[#allocation2 + $0x58] sm:$0xff]  ;;  %v1307_v32 = vsub.f32 %v29_v3, %v48_v6  ;;  %v1315_v36 = vld [vmem:[#allocation2 + $0x60] sm:$0xff]  ;;  %v1319_v37 = vld [vmem:[#allocation2 + $0x68] sm:$0xff]  ;;  %s695_s24 = sshll.u32 %s1232_s1, 4  ;;  %s696_s24 = int_to_ptr.vmem [resolvable:$true] %s695_s24 }
  0x19   :  { %1018 = vmatpush3.bf16.msra.mxu1 %v1266_v12  ;;  %1090 = vmatpush3.bf16.msra.mxu0 %v1266_v12  ;;  %v1293_v25 = vpack.c.bf16 %v66_v20, %v63_v19  ;;  %v1305_v31 = vand.u32 4294901760, %v27_v24  ;;  %v75_v34 = vand.u32 4294901760, %v1299_v28  ;;  %v78_v35 = vand.u32 4294901760, %v1301_v29  ;;  %v1338_v44 = vld [vmem:[#allocation2 + $0x70] sm:$0xff]  ;;  %v1340_v45 = vld [vmem:[#allocation2 + $0x78] sm:$0xff]  ;;  %s1200_s25 = scalar_lea.vmem %s696_s24, 32  ;;  %p1205_p9 = scmp.lt.s32.totalorder %s696_s24, %s696_s24 }
  0x1a   :  { %1019 = vmatprep.subr.bf16.mxu1 %v1229_v0  ;;  %1091 = vmatprep.subr.bf16.mxu0 %v1229_v0  ;;  %v1311_v33 = vpack.c.bf16 %v72_v27, %v69_v26  ;;  %v1321_v38 = vsub.f32 %v30_v4, %v51_v8  ;;  %v1323_v39 = vsub.f32 %v31_v7, %v54_v9  ;;  %v81_v40 = vand.u32 4294901760, %v1315_v36  ;;  %p1201_p8 = scmp.ne.s32.totalorder %s696_s24, %s1200_s25  ;;  %p1206_p10 = scmp.lt.s32.totalorder %s1200_s25, %s1200_s25 }
  0x1b   :  { %v1327_v41 = vsub.f32 %v27_v24, %v1305_v31  ;;  %v1335_v42 = vpack.c.bf16 %v78_v35, %v75_v34  ;;  %v84_v43 = vand.u32 4294901760, %v1319_v37  ;;  %v138_v46 = vand.u32 4294901760, %v1303_v30 }
  0x1c   :  { %v145_v47 = vand.u32 4294901760, %v1307_v32  ;;  %v1346_v48 = vsub.f32 %v32_v10, %v57_v14  ;;  %v1348_v49 = vsub.f32 %v33_v11, %v60_v15  ;;  %v87_v50 = vand.u32 4294901760, %v1338_v44  ;;  %p1207_p11 = por %p1206_p10, %p1205_p9 }
  0x1d   :  { %1021 = vmatpush3.bf16.msra.mxu1 %v1270_v13  ;;  %1093 = vmatpush3.bf16.msra.mxu0 %v1270_v13  ;;  %v90_v51 = vand.u32 4294901760, %v1340_v45  ;;  %v127_v52 = vand.u32 4294901760, %v1327_v41  ;;  %v152_v53 = vand.u32 4294901760, %v1321_v38  ;;  %v1360_v54 = vpack.c.bf16 %v84_v43, %v81_v40 }
  0x1e   :  { %1022 = vmatprep.subr.bf16.mxu1 %v1229_v0  ;;  %1094 = vmatprep.subr.bf16.mxu0 %v1229_v0  ;;  %v139_v55 = vsub.f32 %v1303_v30, %v138_v46  ;;  %v146_v56 = vsub.f32 %v1307_v32, %v145_v47  ;;  %v159_v57 = vand.u32 4294901760, %v1323_v39  ;;  %v1367_v58 = vsub.f32 %v34_v16, %v63_v19  ;;  %p1208_p12 = pnand %p1207_p11, %p1201_p8 }
  0x1f   :  { %v1369_v59 = vsub.f32 %v35_v17, %v66_v20  ;;  %v128_v60 = vsub.f32 %v1327_v41, %v127_v52  ;;  %v153_v61 = vsub.f32 %v1321_v38, %v152_v53  ;;  %v166_v62 = vand.u32 4294901760, %v1346_v48 }
  0x20   :  { %v173_v63 = vand.u32 4294901760, %v1348_v49  ;;  %v1381_v2 = vpack.c.bf16 %v90_v51, %v87_v50  ;;  %v140_v3 = vand.u32 4294901760, %v139_v55  ;;  %v147_v4 = vand.u32 4294901760, %v146_v56 }
  0x21   :  { %1024 = vmatpush3.bf16.msra.mxu1 %v1276_v18  ;;  %1096 = vmatpush3.bf16.msra.mxu0 %v1276_v18  ;;  %v160_v5 = vsub.f32 %v1323_v39, %v159_v57  ;;  %v1387_v6 = vsub.f32 %v1285_v22, %v69_v26  ;;  %v1390_v7 = vsub.f32 %v1287_v23, %v72_v27  ;;  %v129_v9 = vand.u32 4294901760, %v128_v60 }
  0x22   :  { %1025 = vmatprep.subr.bf16.mxu1 %v1229_v0  ;;  %1097 = vmatprep.subr.bf16.mxu0 %v1229_v0  ;;  %v1113_v8 = vpack.c.bf16 %v145_v47, %v138_v46  ;;  %v154_v10 = vand.u32 4294901760, %v153_v61  ;;  %v167_v11 = vsub.f32 %v1346_v48, %v166_v62  ;;  %v174_v14 = vsub.f32 %v1348_v49, %v173_v63 }
  0x23   :  { %v1041_v15 = vpack.c.bf16 %v147_v4, %v140_v3  ;;  %v161_v16 = vand.u32 4294901760, %v160_v5  ;;  %v180_v17 = vand.u32 4294901760, %v1367_v58  ;;  %v187_v19 = vand.u32 4294901760, %v1369_v59 }
  0x24   :  { %v1403_v20 = vsub.f32 %v1299_v28, %v75_v34  ;;  %v1408_v22 = vsub.f32 %v1301_v29, %v78_v35  ;;  %v1116_v23 = vpack.c.bf16 %v159_v57, %v152_v53  ;;  %v168_v24 = vand.u32 4294901760, %v167_v11 }
  0x25   :  { %1027 = vmatpush3.bf16.msra.mxu1 %v1293_v25  ;;  %1099 = vmatpush3.bf16.msra.mxu0 %v1293_v25  ;;  %v175_v26 = vand.u32 4294901760, %v174_v14  ;;  %v194_v27 = vand.u32 4294901760, %v1387_v6  ;;  %v1044_v46 = vpack.c.bf16 %v161_v16, %v154_v10  ;;  %v181_v47 = vsub.f32 %v1367_v58, %v180_v17 }
  0x26   :  { %1028 = vmatprep.subr.bf16.mxu1 %v1229_v0  ;;  %1100 = vmatprep.subr.bf16.mxu0 %v1229_v0  ;;  %v188_v28 = vsub.f32 %v1369_v59, %v187_v19  ;;  %v201_v34 = vand.u32 4294901760, %v1390_v7  ;;  %v1419_v29 = vsub.f32 %v1315_v36, %v81_v40  ;;  %v1424_v35 = vsub.f32 %v1319_v37, %v84_v43 }
  0x27   :  { %v1119_v53 = vpack.c.bf16 %v173_v63, %v166_v62  ;;  %v195_v55 = vsub.f32 %v1387_v6, %v194_v27  ;;  %v208_v56 = vand.u32 4294901760, %v1403_v20  ;;  %v182_v36 = vand.u32 4294901760, %v181_v47 }
  0x28   :  { %v189_v40 = vand.u32 4294901760, %v188_v28  ;;  %v202_v57 = vsub.f32 %v1390_v7, %v201_v34  ;;  %v215_v37 = vand.u32 4294901760, %v1408_v22  ;;  %v1439_v43 = vsub.f32 %v1338_v44, %v87_v50 }
  0x29   :  { %1030 = vmatpush3.bf16.msra.mxu1 %v1311_v33  ;;  %1102 = vmatpush3.bf16.msra.mxu0 %v1311_v33  ;;  %v1444_v60 = vsub.f32 %v1340_v45, %v90_v51  ;;  %v1122_v61 = vpack.c.bf16 %v187_v19, %v180_v17  ;;  %v196_v62 = vand.u32 4294901760, %v195_v55  ;;  %v209_v63 = vsub.f32 %v1403_v20, %v208_v56 }
  0x2a   :  { %1031 = vmatprep.subr.bf16.mxu1 %v1229_v0  ;;  %1103 = vmatprep.subr.bf16.mxu0 %v1229_v0  ;;  %v222_v3 = vand.u32 4294901760, %v1419_v29  ;;  %v1050_v4 = vpack.c.bf16 %v189_v40, %v182_v36  ;;  %v203_v5 = vand.u32 4294901760, %v202_v57  ;;  %v229_v44 = vand.u32 4294901760, %v1424_v35 }
  0x2b   :  { %v1125_v45 = vpack.c.bf16 %v201_v34, %v194_v27  ;;  %v210_v50 = vand.u32 4294901760, %v209_v63  ;;  %v1128_v16 = vpack.c.bf16 %v215_v37, %v208_v56  ;;  %v1068_v55 = vpack.c.bf16 %v1323_v39, %v1321_v38 }
  0x2c   :  { %v223_v51 = vsub.f32 %v1419_v29, %v222_v3  ;;  %v1053_v10 = vpack.c.bf16 %v203_v5, %v196_v62  ;;  %v230_v14 = vsub.f32 %v1424_v35, %v229_v44 }
  0x2d   :  { %1033 = vmatpush3.bf16.msra.mxu1 %v1335_v42  ;;  %1105 = vmatpush3.bf16.msra.mxu0 %v1335_v42 }
  0x2e   :  { %1034 = vmatprep.subr.bf16.mxu1 %v1229_v0  ;;  %1106 = vmatprep.subr.bf16.mxu0 %v1229_v0  ;;  %v224_v17 = vand.u32 4294901760, %v223_v51 }
  0x31   :  { %1036 = vmatpush3.bf16.msra.mxu1 %v1360_v54  ;;  %1108 = vmatpush3.bf16.msra.mxu0 %v1360_v54 }
  0x32   :  { %1037 = vmatprep.subr.bf16.mxu1 %v1229_v0  ;;  %1109 = vmatprep.subr.bf16.mxu0 %v1229_v0 }
  0x35   :  { %1039 = vmatpush3.bf16.msra.mxu1 %v1381_v2  ;;  %1111 = vmatpush3.bf16.msra.mxu0 %v1381_v2 }
  0x36   :  { %1040 = vmatprep.subr.bf16.mxu1 %v1229_v0  ;;  %1112 = vmatprep.subr.bf16.mxu0 %v1229_v0 }
  0x38   :  { %839 = vmatmul.mubr.f32.vlgmr.msra.gmra.mrb[0].mxu1 %v129_v9  ;;  %944 = vmatmul.mubr.f32.vlgmr.msra.gmra.mrb[0].mxu0 %v127_v52  ;;  %v1047_v52 = vpack.c.bf16 %v175_v26, %v168_v24  ;;  %v236_v9 = vand.u32 4294901760, %v1439_v43 }
  0x39   :  { %1042 = vmatpush3.bf16.msra.mxu1 %v1041_v15  ;;  %1114 = vmatpush3.bf16.msra.mxu0 %v1113_v8  ;;  %v216_v8 = vsub.f32 %v1408_v22, %v215_v37  ;;  %v243_v15 = vand.u32 4294901760, %v1444_v60 }
  0x3a   :  { %1043 = vmatprep.subr.bf16.mxu1 %v1229_v0  ;;  %1115 = vmatprep.subr.bf16.mxu0 %v1229_v0  ;;  %v237_v24 = vsub.f32 %v1439_v43, %v236_v9 }
  0x3b   :  { %873 = vmatprep.mubr.msk.f32.mxu1 %vm1230_vm0, %v1231_v1  ;;  %978 = vmatprep.mubr.msk.f32.mxu0 %vm1230_vm0, %v1231_v1  ;;  %v217_v11 = vand.u32 4294901760, %v216_v8  ;;  %v244_v26 = vsub.f32 %v1444_v60, %v243_v15 }
  0x3c   :  { %v238_v47 = vand.u32 4294901760, %v237_v24 }
  0x3d   :  { %1045 = vmatpush3.bf16.msra.mxu1 %v1044_v46  ;;  %1117 = vmatpush3.bf16.msra.mxu0 %v1116_v23  ;;  %v1056_v19 = vpack.c.bf16 %v217_v11, %v210_v50  ;;  %v231_v23 = vand.u32 4294901760, %v230_v14  ;;  %v1131_v46 = vpack.c.bf16 %v229_v44, %v222_v3  ;;  %v245_v28 = vand.u32 4294901760, %v244_v26 }
  0x3e   :  { %1046 = vmatprep.subr.bf16.mxu1 %v1229_v0  ;;  %1118 = vmatprep.subr.bf16.mxu0 %v1229_v0 }
  0x3f   :  { %v1059_v27 = vpack.c.bf16 %v231_v23, %v224_v17  ;;  %v1062_v34 = vpack.c.bf16 %v245_v28, %v238_v47 }
  0x41   :  { %1048 = vmatpush3.bf16.msra.mxu1 %v1047_v52  ;;  %1120 = vmatpush3.bf16.msra.mxu0 %v1119_v53  ;;  %v1134_v52 = vpack.c.bf16 %v243_v15, %v236_v9  ;;  %v1065_v53 = vpack.c.bf16 %v1307_v32, %v1303_v30  ;;  %v1071_v30 = vpack.c.bf16 %v1348_v49, %v1346_v48 }
  0x42   :  { %1049 = vmatprep.subr.bf16.mxu1 %v1229_v0  ;;  %1121 = vmatprep.subr.bf16.mxu0 %v1229_v0 }
  0x45   :  { %1051 = vmatpush3.bf16.msra.mxu1 %v1050_v4  ;;  %1123 = vmatpush3.bf16.msra.mxu0 %v1122_v61 }
  0x46   :  { %1052 = vmatprep.subr.bf16.mxu1 %v1229_v0  ;;  %1124 = vmatprep.subr.bf16.mxu0 %v1229_v0 }
  0x49   :  { %1054 = vmatpush3.bf16.msra.mxu1 %v1053_v10  ;;  %1126 = vmatpush3.bf16.msra.mxu0 %v1125_v45 }
  0x4a   :  { %1055 = vmatprep.subr.bf16.mxu1 %v1229_v0  ;;  %1127 = vmatprep.subr.bf16.mxu0 %v1229_v0 }
  0x4d   :  { %1057 = vmatpush3.bf16.msra.mxu1 %v1056_v19  ;;  %1129 = vmatpush3.bf16.msra.mxu0 %v1128_v16 }
  0x4e   :  { %1058 = vmatprep.subr.bf16.mxu1 %v1229_v0  ;;  %1130 = vmatprep.subr.bf16.mxu0 %v1229_v0 }
  0x51   :  { %1060 = vmatpush3.bf16.msra.mxu1 %v1059_v27  ;;  %1132 = vmatpush3.bf16.msra.mxu0 %v1131_v46 }
  0x52   :  { %1061 = vmatprep.subr.bf16.mxu1 %v1229_v0  ;;  %1133 = vmatprep.subr.bf16.mxu0 %v1229_v0 }
  0x55   :  { %1063 = vmatpush3.bf16.msra.mxu1 %v1062_v34  ;;  %1135 = vmatpush3.bf16.msra.mxu0 %v1134_v52 }
  0x56   :  { %1064 = vmatprep.subr.bf16.mxu1 %v1229_v0  ;;  %1136 = vmatprep.subr.bf16.mxu0 %v1229_v0 }
  0x58   :  { %874 = vmatmul.mubr.f32.vlgmr.msra.gmra.mrb[0].mxu1 %v1305_v31  ;;  %979 = vmatmul.mubr.f32.vlgmr.msra.gmra.mrb[0].mxu0 %v1305_v31 }
  0x59   :  { %1066 = vmatpush3.bf16.msra.mxu1 %v1065_v53  ;;  %1138 = vmatpush3.bf16.msra.mxu0 %v1266_v12  ;;  %v1074_v12 = vpack.c.bf16 %v1369_v59, %v1367_v58 }
  0x5a   :  { %1067 = vmatprep.subr.bf16.mxu1 %v1229_v0  ;;  %1139 = vmatprep.subr.bf16.mxu0 %v1229_v0 }
  0x5b   :  { %908 = vmatprep.mubr.msk.f32.mxu1 %vm1230_vm0, %v1231_v1  ;;  %1013 = vmatprep.mubr.msk.f32.mxu0 %vm1230_vm0, %v1231_v1  ;;  %v1077_v1 = vpack.c.bf16 %v1390_v7, %v1387_v6 }
  0x5d   :  { %1069 = vmatpush3.bf16.msra.mxu1 %v1068_v55  ;;  %1141 = vmatpush3.bf16.msra.mxu0 %v1270_v13  ;;  %v1080_v13 = vpack.c.bf16 %v1408_v22, %v1403_v20 }
  0x5e   :  { %1070 = vmatprep.subr.bf16.mxu1 %v1229_v0  ;;  %1142 = vmatprep.subr.bf16.mxu0 %v1229_v0 }
  0x61   :  { %1072 = vmatpush3.bf16.msra.mxu1 %v1071_v30  ;;  %1144 = vmatpush3.bf16.msra.mxu0 %v1276_v18  ;;  %v1083_v18 = vpack.c.bf16 %v1424_v35, %v1419_v29 }
  0x62   :  { %1073 = vmatprep.subr.bf16.mxu1 %v1229_v0  ;;  %1145 = vmatprep.subr.bf16.mxu0 %v1229_v0 }
  0x65   :  { %1075 = vmatpush3.bf16.msra.mxu1 %v1074_v12  ;;  %1147 = vmatpush3.bf16.msra.mxu0 %v1293_v25  ;;  %v1086_v25 = vpack.c.bf16 %v1444_v60, %v1439_v43 }
  0x66   :  { %1076 = vmatprep.subr.bf16.mxu1 %v1229_v0  ;;  %1148 = vmatprep.subr.bf16.mxu0 %v1229_v0 }
  0x69   :  { %1078 = vmatpush3.bf16.msra.mxu1 %v1077_v1  ;;  %1150 = vmatpush3.bf16.msra.mxu0 %v1311_v33 }
  0x6a   :  { %1079 = vmatprep.subr.bf16.mxu1 %v1229_v0  ;;  %1151 = vmatprep.subr.bf16.mxu0 %v1229_v0 }
  0x6d   :  { %1081 = vmatpush3.bf16.msra.mxu1 %v1080_v13  ;;  %1153 = vmatpush3.bf16.msra.mxu0 %v1335_v42 }
  0x6e   :  { %1082 = vmatprep.subr.bf16.mxu1 %v1229_v0  ;;  %1154 = vmatprep.subr.bf16.mxu0 %v1229_v0 }
  0x71   :  { %1084 = vmatpush3.bf16.msra.mxu1 %v1083_v18  ;;  %1156 = vmatpush3.bf16.msra.mxu0 %v1360_v54 }
  0x72   :  { %1085 = vmatprep.subr.bf16.mxu1 %v1229_v0  ;;  %1157 = vmatprep.subr.bf16.mxu0 %v1229_v0 }
  0x75   :  { %1087 = vmatpush3.bf16.msra.mxu1 %v1086_v25  ;;  %1159 = vmatpush3.bf16.msra.mxu0 %v1381_v2 }
  0x78   :  { %909 = vmatmul.mubr.f32.vlgmr.msra.gmra.mrb[0].mxu1 %v1327_v41  ;;  %1014 = vmatmul.mubr.f32.vlgmr.msra.gmra.mrb[0].mxu0 %v1305_v31 }
 0x14b   :  { %v386_v32 = vpop.f32.mrb[0].mxu1  ;;  %v681_v33 = vpop.f32.mrb[0].mxu0 }
 0x14c   :  { %v1160_v38 = vadd.f32 %v681_v33, %v386_v32  ;;  %v910_v39 = vpop.f32.mrb[1].mxu1  ;;  %v1015_v42 = vpop.f32.mrb[1].mxu0 }
 0x14e   :  { %v685_v48 = vmax.f32 %v1160_v38, 1e-24 }
 0x150   :  { %1176 = vrsqrt.f32 %v685_v48 }
 0x15a   :  { %v1177_v49 = vpop.eup %1176 }
 0x15b   :  { %v687_v54 = vmul.f32 %v1177_v49, %v1281_v21 }
 0x15d   :  { %688 = vst [vmem:[#allocation5] sm:$0x3] %v687_v54 }
 0x15e   :  { %1211 = shalt.err (!%p1208_p12)
}
 0x15f   :  { %s1212_s28 = scalar_lea.hbm %s1529_s2, 32 }
 0x160   :  { %p1213_p13 = scmp.ne.s32.totalorder %s1529_s2, %s1212_s28  ;;  %p1216_p0 = scmp.lt.u32.totalorder %s1212_s28, %s1529_s2 }
 0x162   :  { %p1218_p1 = pnand %p1216_p0, %p1213_p13 }
 0x164   :  { %1221 = shalt.err (!%p1218_p1)
}
 0x165   :  { %698 = dma.vmem_to_hbm [thread:$0]  %s696_s24, 32, %s1529_s2, [#allocation4]  }
 0x166   :  { %1224 = dma.done.wait [#allocation4], 32  }
 0x167   :  { %1225 = vsyncadd [#allocation4], 4294967264 }
 0x168   :  { %702 = vsyncpa [#allocation3], 1 }
 0x169   :  { %703 = vsyncpa [#allocation4], 1 }

</bundles_post_ra>
